<compile_context>
chip_gen: v5e
topology: v5e:2x2
jax: 0.10.0
libtpu: 0.0.40
codegen_flags: <defaults>
</compile_context>

<pallas_src>
import jax
import jax.numpy as jnp
from jax import lax
from jax.experimental import pallas as pl
from jax.experimental.pallas import tpu as pltpu


# --------------------------------------------------------------------------- #
# Kernels
# --------------------------------------------------------------------------- #
def _generator_kernel(x_ref, w_ref, o_ref):
    # x_ref: (tm, D), w_ref: (tn, D) -- contract the shared (full) D axis.
    o_ref[...] = lax.dot_general(
        x_ref[...],
        w_ref[...],
        dimension_numbers=(((1,), (1,)), ((), ())),
        preferred_element_type=jnp.float32,
    ).astype(o_ref.dtype)


def _generator_kernel_ksplit(x_ref, w_ref, o_ref, acc_ref):
    # x_ref: (tm, tk), w_ref: (tn, tk); K is the innermost ("arbitrary") grid
    # axis, so all k steps for one (j, i) output tile are consecutive.
    k = pl.program_id(2)

    @pl.when(k == 0)
    def _():
        acc_ref[...] = jnp.zeros_like(acc_ref)

    acc_ref[...] += lax.dot_general(
        x_ref[...],
        w_ref[...],
        dimension_numbers=(((1,), (1,)), ((), ())),
        preferred_element_type=jnp.float32,
    )

    @pl.when(k == pl.num_programs(2) - 1)
    def _():
        o_ref[...] = acc_ref[...].astype(o_ref.dtype)


# --------------------------------------------------------------------------- #
# Tile / VMEM heuristics
# --------------------------------------------------------------------------- #
def _vmem_info():
    """(physical_vmem_bytes, usable_budget_bytes) for the current generation."""
    try:
        cap = int(pltpu.get_tpu_info().vmem_capacity_bytes)
    except Exception:
        cap = 64 << 20  # conservative fallback (v7x per-TC VMEM)
    budget = int(cap * 0.72)  # leave headroom for Mosaic scratch / semaphores
    return cap, budget


def _shrink(t, quantum, floor):
    return max(floor, ((t // 2) // quantum) * quantum)


def _pick_tiles(M, V, D, in_bytes, out_bytes, budget, tm, tn, tk):
    """Returns (tm, tn, tk, footprint_bytes).  tk == D means no K split."""

    def full_fp(tm_, tn_):
        # double-buffered input tiles + double-buffered output tile
        return 2 * (tm_ + tn_) * D * in_bytes + 2 * tm_ * tn_ * out_bytes

    def ksplit_fp(tm_, tn_, tk_):
        return (2 * (tm_ + tn_) * tk_ * in_bytes
                + 2 * tm_ * tn_ * out_bytes
                + tm_ * tn_ * 4)  # f32 accumulator scratch

    tm = None if tm is None else min(tm, M)
    tn = None if tn is None else min(tn, V)

    # Explicit, valid K-split request (tk must divide D so no masking needed).
    if tk is not None and tk < D and D % tk == 0:
        tm_b = tm if tm is not None else min(M, 512)
        tn_b = tn if tn is not None else min(V, 1024)
        return tm_b, tn_b, tk, ksplit_fp(tm_b, tn_b, tk)

    # ---- Plan A: full-D blocks; the weight leaves HBM exactly once. ----
    tm_a = tm if tm is not None else min(M, 256)
    tn_a = tn if tn is not None else min(V, 2048)
    while full_fp(tm_a, tn_a) > budget and tn_a > 512:
        tn_a = _shrink(tn_a, 128, 512)
    while full_fp(tm_a, tn_a) > budget and tm_a > 128:
        tm_a = _shrink(tm_a, 8, 128)
    fits_a = full_fp(tm_a, tn_a) <= budget

    # Largest candidate K tile that divides D exactly.
    tk_cand = next((c for c in (4096, 2048, 1024, 512) if c < D and D % c == 0),
                   None)

    if fits_a and (tn_a >= min(V, 1024) or tk_cand is None):
        return tm_a, tn_a, D, full_fp(tm_a, tn_a)

    if tk_cand is None:
        # No clean K split possible; take the best full-D config we can get.
        while full_fp(tm_a, tn_a) > budget and tn_a > 128:
            tn_a = _shrink(tn_a, 128, 128)
        while full_fp(tm_a, tn_a) > budget and tm_a > 8:
            tm_a = _shrink(tm_a, 8, 8)
        return tm_a, tn_a, D, full_fp(tm_a, tn_a)

    # ---- Plan B: K-tiled with f32 accumulator (very large D / tight VMEM). ----
    tm_b = tm if tm is not None else min(M, 512)
    tn_b = tn if tn is not None else min(V, 1024)
    tk_b = tk_cand
    while ksplit_fp(tm_b, tn_b, tk_b) > budget and tn_b > 512:
        tn_b = _shrink(tn_b, 128, 512)
    while (ksplit_fp(tm_b, tn_b, tk_b) > budget and tk_b > 512
           and D % (tk_b // 2) == 0):
        tk_b //= 2
    while ksplit_fp(tm_b, tn_b, tk_b) > budget and tm_b > 128:
        tm_b = _shrink(tm_b, 8, 128)
    return tm_b, tn_b, tk_b, ksplit_fp(tm_b, tn_b, tk_b)


# --------------------------------------------------------------------------- #
# Public entry point
# --------------------------------------------------------------------------- #
def generator_forward(x, weight, *, out_dtype=None, tm=None, tn=None, tk=None):
    """Bias-free LM head: logits = x @ weight.T  (== nn.Linear(d_model, V, bias=False)).

    x:      (..., d_model) activations, already in the desired compute dtype.
    weight: (vocab_size, d_model) in PyTorch layout, already in the desired
            compute dtype (cast it once, persistently -- NOT per call).
    out_dtype: logits dtype (default: x.dtype). Use bf16 to halve the M x V write.
    """
    *lead, D = x.shape
    V, D_w = weight.shape
    assert D == D_w, f"d_model mismatch: {D} vs {D_w}"
    M = 1
    for s in lead:
        M *= int(s)

    if x.dtype != weight.dtype:
        # Casting the (small) activation is cheap; the big weight stays untouched.
        x = x.astype(weight.dtype)
    if out_dtype is None:
        out_dtype = x.dtype

    x2d = x.reshape(M, D)

    in_bytes = jnp.dtype(x.dtype).itemsize
    out_bytes = jnp.dtype(out_dtype).itemsize

    cap, budget = _vmem_info()
    tm, tn, tk, fp = _pick_tiles(M, V, D, in_bytes, out_bytes, budget, tm, tn, tk)

    nj = pl.cdiv(V, tn)   # weight/vocab tiles -> outer axis (megacore split axis)
    ni = pl.cdiv(M, tm)   # activation tiles   -> middle axis
    nk = pl.cdiv(D, tk)   # reduction tiles    -> innermost axis (when K-tiled)

    vmem_limit = max(32 << 20, int(fp * 1.4) + (2 << 20))
    vmem_limit = min(vmem_limit, cap - (8 << 20))  # never the whole physical VMEM

    # Actual HBM traffic: activations re-streamed nj times; weight streamed once
    # for full-D blocks (ni times when K-tiled); plus the logits write.
    w_passes = 1 if nk == 1 else ni
    cost = pl.CostEstimate(
        flops=2 * M * V * D,
        transcendentals=0,
        bytes_accessed=(nj * M * D * in_bytes
                        + w_passes * V * D * in_bytes
                        + M * V * out_bytes),
    )

    if nk == 1:
        out = pl.pallas_call(
            _generator_kernel,
            out_shape=jax.ShapeDtypeStruct((M, V), out_dtype),
            grid_spec=pltpu.PrefetchScalarGridSpec(
                num_scalar_prefetch=0,
                grid=(nj, ni),
                in_specs=[
                    # activation tile: depends only on the inner index i
                    pl.BlockSpec((tm, D), lambda j, i: (i, 0)),
                    # weight tile (untransposed): depends only on the outer j,
                    # so each (tn, D) slab is DMA'd from HBM exactly once.
                    pl.BlockSpec((tn, D), lambda j, i: (j, 0)),
                ],
                out_specs=pl.BlockSpec((tm, tn), lambda j, i: (i, j)),
            ),
            compiler_params=pltpu.CompilerParams(
                # Only j is parallel: a v7x core split lands on the vocab axis,
                # keeping total weight HBM traffic at V*D (not 2x).
                dimension_semantics=("parallel", "arbitrary"),
                vmem_limit_bytes=vmem_limit,
            ),
            cost_estimate=cost,
        )(x2d, weight)
    else:
        out = pl.pallas_call(
            _generator_kernel_ksplit,
            out_shape=jax.ShapeDtypeStruct((M, V), out_dtype),
            grid_spec=pltpu.PrefetchScalarGridSpec(
                num_scalar_prefetch=0,
                grid=(nj, ni, nk),
                in_specs=[
                    pl.BlockSpec((tm, tk), lambda j, i, k: (i, k)),
                    pl.BlockSpec((tn, tk), lambda j, i, k: (j, k)),
                ],
                out_specs=pl.BlockSpec((tm, tn), lambda j, i, k: (i, j)),
                scratch_shapes=[pltpu.VMEM((tm, tn), jnp.float32)],
            ),
            compiler_params=pltpu.CompilerParams(
                dimension_semantics=("parallel", "arbitrary", "arbitrary"),
                vmem_limit_bytes=vmem_limit,
            ),
            cost_estimate=cost,
        )(x2d, weight)

    return out.reshape(*lead, V)


# --------------------------------------------------------------------------- #
# Self-test
# --------------------------------------------------------------------------- #
if __name__ == "__main__":
    batch, seq, d_model, vocab_size = 2, 8, 32, 128

    key = jax.random.PRNGKey(0)
    kx, kw = jax.random.split(key)

    x = jax.random.normal(kx, (batch, seq, d_model), dtype=jnp.float32)
    # PyTorch Linear default init: U(-1/sqrt(D), 1/sqrt(D))
    bound = 1.0 / (d_model ** 0.5)
    weight = jax.random.uniform(
        kw, (vocab_size, d_model), minval=-bound, maxval=bound, dtype=jnp.float32
    )

    # --- f32 path (weight used exactly as given, matching nn.Linear) ---
    out_f32 = jax.block_until_ready(generator_forward(x, weight))
    assert out_f32.shape == (batch, seq, vocab_size)
    ref_f32 = jnp.einsum("bsd,vd->bsv", x, weight)
    assert jnp.allclose(out_f32, ref_f32, atol=1e-5, rtol=1e-5)

    # --- bf16 compute path: weight cast ONCE outside the forward, not per call ---
    w_bf16 = weight.astype(jnp.bfloat16)   # persistent compute-dtype parameter
    x_bf16 = x.astype(jnp.bfloat16)
    out_bf16 = jax.block_until_ready(
        generator_forward(x_bf16, w_bf16, out_dtype=jnp.float32)
    )
    ref_bf16 = jnp.einsum(
        "bsd,vd->bsv", x_bf16, w_bf16, preferred_element_type=jnp.float32
    )
    assert out_bf16.shape == (batch, seq, vocab_size)
    assert jnp.allclose(out_bf16, ref_bf16, atol=1e-3, rtol=1e-3)

    # --- K-tiled (d_model split) accumulator path, forced via tk ---
    d2, v2 = 256, 256
    kx2, kw2 = jax.random.split(jax.random.PRNGKey(1))
    x2 = jax.random.normal(kx2, (batch, seq, d2), dtype=jnp.float32).astype(
        jnp.bfloat16
    )
    w2 = jax.random.uniform(
        kw2, (v2, d2), minval=-1.0 / (d2 ** 0.5), maxval=1.0 / (d2 ** 0.5),
        dtype=jnp.float32,
    ).astype(jnp.bfloat16)
    out_k = jax.block_until_ready(
        generator_forward(x2, w2, out_dtype=jnp.float32, tk=128)
    )
    ref_k = jnp.einsum("bsd,vd->bsv", x2, w2, preferred_element_type=jnp.float32)
    assert out_k.shape == (batch, seq, v2)
    assert jnp.allclose(out_k, ref_k, atol=1e-3, rtol=1e-3)

    print("KERNEL_OK")
</pallas_src>

<mosaic_0001>
module attributes {stable_mosaic.version = 11 : i64} {
  func.func @_generator_kernel(%arg0: i32, %arg1: i32, %arg2: memref<16x32xf32, #tpu.memory_space<vmem>>, %arg3: memref<128x32xf32, #tpu.memory_space<vmem>>, %arg4: memref<16x128xf32, #tpu.memory_space<vmem>>) attributes {dimension_semantics = [#tpu.dimension_semantics<parallel>, #tpu.dimension_semantics<arbitrary>], iteration_bounds = array<i64: 1, 1>, scalar_prefetch = 0 : i64, scratch_operands = 0 : i64, tpu.core_type = #tpu.core_type<tc>, window_params = [{transform_indices = @transform_0, window_bounds = array<i64: 16, 32>}, {transform_indices = @transform_1, window_bounds = array<i64: 128, 32>}, {transform_indices = @transform_2, window_bounds = array<i64: 16, 128>}]} {
    %c0 = arith.constant 0 : index
    %c0_0 = arith.constant 0 : index
    %0 = vector.load %arg2[%c0, %c0_0] : memref<16x32xf32, #tpu.memory_space<vmem>>, vector<16x32xf32>
    %c0_1 = arith.constant 0 : index
    %c0_2 = arith.constant 0 : index
    %1 = vector.load %arg3[%c0_1, %c0_2] : memref<128x32xf32, #tpu.memory_space<vmem>>, vector<128x32xf32>
    %cst = arith.constant dense<0.000000e+00> : vector<16x128xf32>
    %2 = tpu.matmul %0, %1, %cst {dimension_numbers = #tpu.dot_dimension_numbers<[1], [1], [0], [0], [0, 0, 1, 0], [], []>} : vector<16x32xf32>, vector<128x32xf32>, vector<16x128xf32> -> vector<16x128xf32>
    %c0_3 = arith.constant 0 : index
    %c0_4 = arith.constant 0 : index
    %3 = vector.load %arg4[%c0_3, %c0_4] : memref<16x128xf32, #tpu.memory_space<vmem>>, vector<16x128xf32>
    tpu.vector_store %arg4[%c0_3, %c0_4], %2 {strides = array<i32>} : memref<16x128xf32, #tpu.memory_space<vmem>>, vector<16x128xf32>,
    return
  }
  func.func @transform_0(%arg0: i32, %arg1: i32) -> (i32, i32) {
    %c0_i32 = arith.constant 0 : i32
    %c0_i32_0 = arith.constant 0 : i32
    return %arg1, %c0_i32 : i32, i32
  }
  func.func @transform_1(%arg0: i32, %arg1: i32) -> (i32, i32) {
    %c0_i32 = arith.constant 0 : i32
    %c0_i32_0 = arith.constant 0 : i32
    return %arg0, %c0_i32 : i32, i32
  }
  func.func @transform_2(%arg0: i32, %arg1: i32) -> (i32, i32) {
    %c0_i32 = arith.constant 0 : i32
    return %arg1, %arg0 : i32, i32
  }
}

</mosaic_0001>

<bundles_post_ra>
// kernel: tpu_custom_call.1
= control target key start
LH: loop header
LB: loop body
LE: loop exit
PB: predicated region body
PF: predicated region fallthrough
CT: control target
= control target key end

     0   :  { %vm30_vm0 = vcmask 261120   ;;  %s300_s0 = inlined_call_operand.vmem [shape: f32[16,32], index: 0, kind: input, shape index: {}]   ;;  %s301_s1 = inlined_call_operand.vmem [shape: f32[128,32], index: 1, kind: input, shape index: {}]   ;;  %s302_s2 = inlined_call_operand.hbm [shape: f32[16,128], index: 2, kind: output, shape index: {}]  }
   0x1   :  { %v29_v0 = vld [vmem:[%s301_s1 + $0x78] sm:$0xff]  ;;  %v28_v1 = vld [vmem:[%s301_s1 + $0x70] sm:$0xff] }
   0x2   :  { %128 = vmatpush.xpose.msk.msra.mxu0 %vm30_vm0, %v29_v0  ;;  %146 = vmatpush.xpose.msk.msra.mxu1 %vm30_vm0, %v29_v0 }
   0x3   :  { %7 = vsyncpa [#allocation3], 0  ;;  %v27_v2 = vld [vmem:[%s301_s1 + $0x68] sm:$0xff]  ;;  %v26_v3 = vld [vmem:[%s301_s1 + $0x60] sm:$0xff]  ;;  %s191_s17 = smov [#allocation2]   ;;  %s116_s20 = sshll.u32 %s302_s2, 4  ;;  %s117_s20 = int_to_ptr.hbm [resolvable:$true] %s116_s20 }
   0x4   :  { %v25_v4 = vld [vmem:[%s301_s1 + $0x58] sm:$0xff]  ;;  %v24_v5 = vld [vmem:[%s301_s1 + $0x50] sm:$0xff]  ;;  %v23_v6 = vld [vmem:[%s301_s1 + $0x48] sm:$0xff]  ;;  %s114_s18 = sshll.u32 %s191_s17, 4  ;;  %s192_s21 = smov 128   ;;  %s115_s18 = int_to_ptr.vmem [resolvable:$true] %s114_s18 }
   0x5   :  { %v22_v7 = vld [vmem:[%s301_s1 + $0x40] sm:$0xff]  ;;  %v21_v8 = vld [vmem:[%s301_s1 + $0x38] sm:$0xff]  ;;  %v20_v9 = vld [vmem:[%s301_s1 + $0x30] sm:$0xff]  ;;  %s193_s22 = smov 8  }
   0x6   :  { %129 = vmatpush.xpose.msk.msra.mxu0 %vm30_vm0, %v28_v1  ;;  %147 = vmatpush.xpose.msk.msra.mxu1 %vm30_vm0, %v28_v1  ;;  %v19_v10 = vld [vmem:[%s301_s1 + $0x28] sm:$0xff]  ;;  %v18_v11 = vld [vmem:[%s301_s1 + $0x20] sm:$0xff]  ;;  %v17_v12 = vld [vmem:[%s301_s1 + $0x18] sm:$0xff] }
   0x7   :  { %v16_v13 = vld [vmem:[%s301_s1 + $0x10] sm:$0xff]  ;;  %v15_v14 = vld [vmem:[%s301_s1 + $0x8] sm:$0xff]  ;;  %v14_v15 = vld [vmem:[%s301_s1] sm:$0xff] }
   0x8   :  { %v12_v16 = vld [vmem:[%s300_s0] sm:$0xff]  ;;  %v13_v17 = vld [vmem:[%s300_s0 + $0x8] sm:$0xff] }
   0xa   :  { %130 = vmatpush.xpose.msk.msra.mxu0 %vm30_vm0, %v27_v2  ;;  %148 = vmatpush.xpose.msk.msra.mxu1 %vm30_vm0, %v27_v2 }
   0xe   :  { %131 = vmatpush.xpose.msk.msra.mxu0 %vm30_vm0, %v26_v3  ;;  %149 = vmatpush.xpose.msk.msra.mxu1 %vm30_vm0, %v26_v3 }
  0x12   :  { %132 = vmatpush.xpose.msk.msra.mxu0 %vm30_vm0, %v25_v4  ;;  %150 = vmatpush.xpose.msk.msra.mxu1 %vm30_vm0, %v25_v4 }
  0x16   :  { %133 = vmatpush.xpose.msk.msra.mxu0 %vm30_vm0, %v24_v5  ;;  %151 = vmatpush.xpose.msk.msra.mxu1 %vm30_vm0, %v24_v5 }
  0x1a   :  { %134 = vmatpush.xpose.msk.msra.mxu0 %vm30_vm0, %v23_v6  ;;  %152 = vmatpush.xpose.msk.msra.mxu1 %vm30_vm0, %v23_v6 }
  0x1e   :  { %135 = vmatpush.xpose.msk.msra.mxu0 %vm30_vm0, %v22_v7  ;;  %153 = vmatpush.xpose.msk.msra.mxu1 %vm30_vm0, %v22_v7 }
  0x22   :  { %136 = vmatpush.xpose.msk.msra.mxu0 %vm30_vm0, %v21_v8  ;;  %154 = vmatpush.xpose.msk.msra.mxu1 %vm30_vm0, %v21_v8 }
  0x26   :  { %137 = vmatpush.xpose.msk.msra.mxu0 %vm30_vm0, %v20_v9  ;;  %155 = vmatpush.xpose.msk.msra.mxu1 %vm30_vm0, %v20_v9 }
  0x2a   :  { %138 = vmatpush.xpose.msk.msra.mxu0 %vm30_vm0, %v19_v10  ;;  %156 = vmatpush.xpose.msk.msra.mxu1 %vm30_vm0, %v19_v10 }
  0x2e   :  { %139 = vmatpush.xpose.msk.msra.mxu0 %vm30_vm0, %v18_v11  ;;  %157 = vmatpush.xpose.msk.msra.mxu1 %vm30_vm0, %v18_v11 }
  0x32   :  { %140 = vmatpush.xpose.msk.msra.mxu0 %vm30_vm0, %v17_v12  ;;  %158 = vmatpush.xpose.msk.msra.mxu1 %vm30_vm0, %v17_v12 }
  0x36   :  { %141 = vmatpush.xpose.msk.msra.mxu0 %vm30_vm0, %v16_v13  ;;  %159 = vmatpush.xpose.msk.msra.mxu1 %vm30_vm0, %v16_v13 }
  0x3a   :  { %142 = vmatpush.xpose.msk.msra.mxu0 %vm30_vm0, %v15_v14  ;;  %160 = vmatpush.xpose.msk.msra.mxu1 %vm30_vm0, %v15_v14 }
  0x3e   :  { %143 = vmatpush.xpose.msk.msra.mxu0 %vm30_vm0, %v14_v15  ;;  %161 = vmatpush.xpose.msk.msra.mxu1 %vm30_vm0, %v14_v15 }
  0x41   :  { %144 = vmatmul.msk.f32.vlgmr.msra.gmra.mxu0 %vm30_vm0, %v12_v16  ;;  %145 = vmatmul.msk.f32.vlgmr.msra.gmra.mxu1 %vm30_vm0, %v13_v17 }
  0xbe   :  { %v102_v18 = vpop.f32.mrf.mxu0  ;;  %v105_v19 = vpop.f32.mrf.mxu1 }
  0xbf   :  { %108 = vst [vmem:[#allocation2] sm:$0xff] %v102_v18 }
  0xc0   :  { %109 = vst [vmem:[#allocation2 + $0x8] sm:$0xff] %v105_v19 }
  0xc1   :  { %122 = dma.vmem_to_hbm [thread:$0]  %s115_s18, 256, %s117_s20, [#allocation3], %s192_s21, %s192_s21, %s193_s22  }
  0xc2   :  { %189 = dma.done.wait [#allocation3], 256  }
  0xc3   :  { %190 = vsyncadd [#allocation3], 4294967040 }
  0xc4   :  { %127 = vsyncpa [#allocation3], 1 }

</bundles_post_ra>
